<compile_context>
chip_gen: v6e
topology: v6e:2x2x1
jax: 0.10.0
libtpu: 0.0.40
codegen_flags: <defaults>
</compile_context>

<pallas_src>
from functools import partial

import jax
import jax.numpy as jnp
from jax.experimental import pallas as pl
from jax.experimental.pallas import tpu as pltpu

LANE = 128


def _round_up(x, m):
    return (x + m - 1) // m * m


def projector_kernel(xf_ref, st_ref, weff_ref, wst_ref, b1_ref,
                     w2_ref, b2_ref, wout_ref, out_ref, *, out_dim):
    # Inputs arrive f32; cast to bf16 right before the MXU (cheap pack, hidden under
    # the matmul).  All accumulation stays f32 via preferred_element_type.
    xb = xf_ref[...].astype(weff_ref.dtype)
    sb = st_ref[...].astype(wst_ref.dtype)

    # Layer 1: circular conv + concat folded into two MXU matmuls (f32 accumulation).
    h = (jnp.dot(xb, weff_ref[...], preferred_element_type=jnp.float32)
         + jnp.dot(sb, wst_ref[...], preferred_element_type=jnp.float32)
         + b1_ref[...])
    h = jnp.maximum(h, 0.0)

    # Layer 2: Linear + ReLU.
    h = jnp.dot(h.astype(w2_ref.dtype), w2_ref[...],
                preferred_element_type=jnp.float32) + b2_ref[...]
    h = jnp.maximum(h, 0.0)

    # Output layer (no bias).  wout is lane-padded to 128 for the MXU; only the true
    # out_dim columns are stored (masked vst is negligible — stores aren't binding).
    acc = jnp.dot(h.astype(wout_ref.dtype), wout_ref[...],
                  preferred_element_type=jnp.float32)
    out_ref[...] = acc[:, :out_dim].astype(out_ref.dtype)


def _fold_conv_into_w1(convw, w1_conv):
    """Fold Conv1d(seq_len->1, K, padding=1, circular, no bias) into the first Linear.

    conv_out[b, e] = sum_{l,k} convw[l,k] * x[b, l, (e + k - 1) mod E]
    => sum_e conv_out[b,e] * w1_conv[e,h] = sum_{l,w} x[b,l,w] * W_eff[l,w,h]
       with W_eff[l,w,h] = sum_k convw[l,k] * w1_conv[(w - k + 1) mod E, h]
    """
    L, K = convw.shape
    E, H = w1_conv.shape
    w_idx = jnp.arange(E)[:, None]
    k_idx = jnp.arange(K)[None, :]
    gather = (w_idx - k_idx + 1) % E                 # [E, K]
    w1_g = w1_conv[gather]                           # [E, K, H]
    w_eff = jnp.einsum('lk,wkh->lwh', convw, w1_g)   # [L, E, H]
    return w_eff.reshape(L * E, H)


def projector_forward(x, stats, convw, w1, b1, w2, b2, wout,
                      *, compute_dtype=jnp.bfloat16, block_b=4096):
    """x: [B, L, E], stats: [B, 1, E] (or [B, E])  ->  [B, output_dim] (float32)."""
    B, L, E = x.shape
    K = convw.shape[1]
    assert K == 3, "Conv1d(padding=1, circular) only keeps width E for kernel_size=3"
    H1 = w1.shape[1]
    H2 = w2.shape[1]
    out_dim = wout.shape[1]

    # ---- trace-time parameter folding (conv + concat -> first Linear) ----
    w_eff = _fold_conv_into_w1(convw.astype(jnp.float32),
                               w1[:E].astype(jnp.float32))       # [L*E, H1]
    w_stats = w1[E:]                                             # [E, H1]

    # wout: zero-pad columns to 128 lanes for the MXU; the kernel slices back to
    # out_dim before storing, so the *stored* output stays (B, out_dim).
    out_pad = _round_up(max(out_dim, LANE), LANE)
    wout_p = jnp.zeros((H2, out_pad), jnp.float32).at[:, :out_dim].set(
        wout.astype(jnp.float32))

    # MXU operands (weights) in bf16 (f32 accumulation); biases stay f32 for the VPU.
    w_eff = w_eff.astype(compute_dtype)
    w_stats = w_stats.astype(compute_dtype)
    w2_c = w2.astype(compute_dtype)
    wout_p = wout_p.astype(compute_dtype)
    b1_c = jnp.reshape(b1, (1, H1)).astype(jnp.float32)
    b2_c = jnp.reshape(b2, (1, H2)).astype(jnp.float32)

    # ---- activations: free reshapes only (no wrapper-side cast/pad passes over x) ----
    xf = jnp.reshape(x, (B, L * E)).astype(jnp.float32)          # [B, L*E]
    st = jnp.reshape(stats, (B, E)).astype(jnp.float32)          # [B, E]

    # Batch tile: as large as possible (amortize ~0.35us/step overhead), but capped at
    # cdiv(B, 2) so the 'parallel' axis keeps >=2 steps for v7x's two TensorCores.
    tb = max(8, min(block_b,
                    _round_up(max(pl.cdiv(B, 2), 8), 8),
                    _round_up(B, 8)))
    grid = (pl.cdiv(B, tb),)                 # ragged last block, no batch padding
    const = lambda i: (0, 0)                 # weights: same block -> VMEM-resident

    flops = 2 * B * ((L + 1) * E * H1 + H1 * H2 + H2 * out_dim)
    bytes_accessed = (
        B * (L * E + E) * 4                                       # f32 activations in
        + B * out_dim * 4                                         # f32 output
        + (w_eff.size + w_stats.size + w2_c.size + wout_p.size) * 2
        + (b1_c.size + b2_c.size) * 4)

    y = pl.pallas_call(
        partial(projector_kernel, out_dim=out_dim),
        out_shape=jax.ShapeDtypeStruct((B, out_dim), jnp.float32),
        grid_spec=pltpu.PrefetchScalarGridSpec(
            num_scalar_prefetch=0,
            grid=grid,
            in_specs=[
                pl.BlockSpec((tb, L * E), lambda i: (i, 0)),     # x (flattened, f32)
                pl.BlockSpec((tb, E), lambda i: (i, 0)),         # stats (f32)
                pl.BlockSpec((L * E, H1), const),                # folded conv @ w1
                pl.BlockSpec((E, H1), const),                    # stats half of w1
                pl.BlockSpec((1, H1), const),                    # b1
                pl.BlockSpec((H1, H2), const),                   # w2
                pl.BlockSpec((1, H2), const),                    # b2
                pl.BlockSpec((H2, out_pad), const),              # wout (lane-padded)
            ],
            out_specs=pl.BlockSpec((tb, out_dim), lambda i: (i, 0)),
        ),
        compiler_params=pltpu.CompilerParams(
            dimension_semantics=("parallel",),   # batch axis -> both TCs on v7x
            vmem_limit_bytes=32 * 1024 * 1024,   # safe on v7x; plenty for tb<=4096
        ),
        cost_estimate=pl.CostEstimate(
            flops=flops, transcendentals=0, bytes_accessed=bytes_accessed),
    )(xf, st, w_eff, w_stats, b1_c, w2_c, b2_c, wout_p)

    return y


def reference_forward(x, stats, convw, w1, b1, w2, b2, wout):
    """Pure-JAX f32 reference of the original module semantics."""
    B, L, E = x.shape
    K = convw.shape[1]
    x_pad = jnp.concatenate([x[:, :, -1:], x, x[:, :, :1]], axis=2)
    conv = sum(jnp.einsum('ble,l->be', x_pad[:, :, k:k + E], convw[:, k])
               for k in range(K))
    z = jnp.concatenate([conv, jnp.reshape(stats, (B, E))], axis=1)
    h = jax.nn.relu(z @ w1 + jnp.reshape(b1, (1, -1)))
    h = jax.nn.relu(h @ w2 + jnp.reshape(b2, (1, -1)))
    return h @ wout


if __name__ == "__main__":
    # module config (small, consistent with Projector.__init__)
    B, enc_in, seq_len = 2, 4, 8
    hidden_dims = [32, 32]
    hidden_layers = 2
    output_dim = 4
    kernel_size = 3

    key = jax.random.PRNGKey(0)
    ks = jax.random.split(key, 8)

    # deterministic synthetic parameters
    # (PyTorch Linear weight [out,in] stored transposed [in,out]; Conv1d weight
    #  [1, seq_len, 3] squeezed to [seq_len, 3])
    convw = 0.1 * jax.random.normal(ks[0], (seq_len, kernel_size), jnp.float32)
    w1 = 0.1 * jax.random.normal(ks[1], (2 * enc_in, hidden_dims[0]), jnp.float32)
    b1 = 0.1 * jax.random.normal(ks[2], (1, hidden_dims[0]), jnp.float32)
    w2 = 0.1 * jax.random.normal(ks[3], (hidden_dims[0], hidden_dims[1]), jnp.float32)
    b2 = 0.1 * jax.random.normal(ks[4], (1, hidden_dims[1]), jnp.float32)
    wout = 0.1 * jax.random.normal(ks[5], (hidden_dims[1], output_dim), jnp.float32)

    # inputs
    x = jax.random.normal(ks[6], (B, seq_len, enc_in), jnp.float32)
    stats = jax.random.normal(ks[7], (B, 1, enc_in), jnp.float32)

    y = projector_forward(x, stats, convw, w1, b1, w2, b2, wout)
    y = jax.block_until_ready(y)

    y_ref = reference_forward(x, stats, convw, w1, b1, w2, b2, wout)
    assert y.shape == (B, output_dim)
    # bf16 MXU operands with f32 accumulation -> relaxed tolerance vs f32 reference
    assert jnp.allclose(y, y_ref, atol=2e-2, rtol=2e-2), (
        "mismatch vs pure-JAX reference: max abs diff "
        f"{float(jnp.max(jnp.abs(y - y_ref)))}")

    print("KERNEL_OK")
</pallas_src>

<mosaic_0001>
module attributes {stable_mosaic.version = 11 : i64} {
  func.func @projector_kernel(%arg0: i32, %arg1: memref<8x32xf32, #tpu.memory_space<vmem>>, %arg2: memref<8x4xf32, #tpu.memory_space<vmem>>, %arg3: memref<32x32xbf16, #tpu.memory_space<vmem>>, %arg4: memref<4x32xbf16, #tpu.memory_space<vmem>>, %arg5: memref<1x32xf32, #tpu.memory_space<vmem>>, %arg6: memref<32x32xbf16, #tpu.memory_space<vmem>>, %arg7: memref<1x32xf32, #tpu.memory_space<vmem>>, %arg8: memref<32x128xbf16, #tpu.memory_space<vmem>>, %arg9: memref<8x4xf32, #tpu.memory_space<vmem>>) attributes {dimension_semantics = [#tpu.dimension_semantics<parallel>], iteration_bounds = array<i64: 1>, scalar_prefetch = 0 : i64, scratch_operands = 0 : i64, tpu.core_type = #tpu.core_type<tc>, window_params = [{transform_indices = @transform_0, window_bounds = array<i64: 8, 32>}, {transform_indices = @transform_1, window_bounds = array<i64: 8, 4>}, {pipeline_mode = #tpu.pipeline_mode<synchronous>, transform_indices = @transform_2, window_bounds = array<i64: 32, 32>}, {pipeline_mode = #tpu.pipeline_mode<synchronous>, transform_indices = @transform_3, window_bounds = array<i64: 4, 32>}, {pipeline_mode = #tpu.pipeline_mode<synchronous>, transform_indices = @transform_4, window_bounds = array<i64: 1, 32>}, {pipeline_mode = #tpu.pipeline_mode<synchronous>, transform_indices = @transform_5, window_bounds = array<i64: 32, 32>}, {pipeline_mode = #tpu.pipeline_mode<synchronous>, transform_indices = @transform_6, window_bounds = array<i64: 1, 32>}, {pipeline_mode = #tpu.pipeline_mode<synchronous>, transform_indices = @transform_7, window_bounds = array<i64: 32, 128>}, {transform_indices = @transform_8, window_bounds = array<i64: 8, 4>}]} {
    %c0 = arith.constant 0 : index
    %c0_0 = arith.constant 0 : index
    %0 = vector.load %arg1[%c0, %c0_0] : memref<8x32xf32, #tpu.memory_space<vmem>>, vector<8x32xf32>
    %1 = arith.truncf %0 : vector<8x32xf32> to vector<8x32xbf16>
    %c0_1 = arith.constant 0 : index
    %c0_2 = arith.constant 0 : index
    %2 = vector.load %arg2[%c0_1, %c0_2] : memref<8x4xf32, #tpu.memory_space<vmem>>, vector<8x4xf32>
    %3 = arith.truncf %2 : vector<8x4xf32> to vector<8x4xbf16>
    %c0_3 = arith.constant 0 : index
    %c0_4 = arith.constant 0 : index
    %4 = vector.load %arg3[%c0_3, %c0_4] : memref<32x32xbf16, #tpu.memory_space<vmem>>, vector<32x32xbf16>
    %cst = arith.constant dense<0.000000e+00> : vector<8x32xf32>
    %5 = tpu.matmul %1, %4, %cst {dimension_numbers = #tpu.dot_dimension_numbers<[1], [0], [0], [1], [0, 0, 1, 1], [], []>} : vector<8x32xbf16>, vector<32x32xbf16>, vector<8x32xf32> -> vector<8x32xf32>
    %c0_5 = arith.constant 0 : index
    %c0_6 = arith.constant 0 : index
    %6 = vector.load %arg4[%c0_5, %c0_6] : memref<4x32xbf16, #tpu.memory_space<vmem>>, vector<4x32xbf16>
    %cst_7 = arith.constant dense<0.000000e+00> : vector<8x32xf32>
    %7 = tpu.matmul %3, %6, %cst_7 {dimension_numbers = #tpu.dot_dimension_numbers<[1], [0], [0], [1], [0, 0, 1, 1], [], []>} : vector<8x4xbf16>, vector<4x32xbf16>, vector<8x32xf32> -> vector<8x32xf32>
    %8 = arith.addf %5, %7 : vector<8x32xf32>
    %c0_8 = arith.constant 0 : index
    %c0_9 = arith.constant 0 : index
    %9 = vector.load %arg5[%c0_8, %c0_9] : memref<1x32xf32, #tpu.memory_space<vmem>>, vector<1x32xf32>
    %10 = vector.broadcast %9 : vector<1x32xf32> to vector<8x32xf32>
    %11 = arith.addf %8, %10 : vector<8x32xf32>
    %cst_10 = arith.constant 0.000000e+00 : f32
    %12 = vector.broadcast %cst_10 : f32 to vector<8x32xf32>
    %13 = arith.maximumf %11, %12 : vector<8x32xf32>
    %14 = arith.truncf %13 : vector<8x32xf32> to vector<8x32xbf16>
    %c0_11 = arith.constant 0 : index
    %c0_12 = arith.constant 0 : index
    %15 = vector.load %arg6[%c0_11, %c0_12] : memref<32x32xbf16, #tpu.memory_space<vmem>>, vector<32x32xbf16>
    %cst_13 = arith.constant dense<0.000000e+00> : vector<8x32xf32>
    %16 = tpu.matmul %14, %15, %cst_13 {dimension_numbers = #tpu.dot_dimension_numbers<[1], [0], [0], [1], [0, 0, 1, 1], [], []>} : vector<8x32xbf16>, vector<32x32xbf16>, vector<8x32xf32> -> vector<8x32xf32>
    %c0_14 = arith.constant 0 : index
    %c0_15 = arith.constant 0 : index
    %17 = vector.load %arg7[%c0_14, %c0_15] : memref<1x32xf32, #tpu.memory_space<vmem>>, vector<1x32xf32>
    %18 = vector.broadcast %17 : vector<1x32xf32> to vector<8x32xf32>
    %19 = arith.addf %16, %18 : vector<8x32xf32>
    %cst_16 = arith.constant 0.000000e+00 : f32
    %20 = vector.broadcast %cst_16 : f32 to vector<8x32xf32>
    %21 = arith.maximumf %19, %20 : vector<8x32xf32>
    %22 = arith.truncf %21 : vector<8x32xf32> to vector<8x32xbf16>
    %c0_17 = arith.constant 0 : index
    %c0_18 = arith.constant 0 : index
    %23 = vector.load %arg8[%c0_17, %c0_18] : memref<32x128xbf16, #tpu.memory_space<vmem>>, vector<32x128xbf16>
    %cst_19 = arith.constant dense<0.000000e+00> : vector<8x128xf32>
    %24 = tpu.matmul %22, %23, %cst_19 {dimension_numbers = #tpu.dot_dimension_numbers<[1], [0], [0], [1], [0, 0, 1, 1], [], []>} : vector<8x32xbf16>, vector<32x128xbf16>, vector<8x128xf32> -> vector<8x128xf32>
    %25 = vector.extract_strided_slice %24 {offsets = [0, 0], sizes = [8, 4], strides = [1, 1]} : vector<8x128xf32> to vector<8x4xf32>
    %c0_20 = arith.constant 0 : index
    %c0_21 = arith.constant 0 : index
    %26 = vector.load %arg9[%c0_20, %c0_21] : memref<8x4xf32, #tpu.memory_space<vmem>>, vector<8x4xf32>
    tpu.vector_store %arg9[%c0_20, %c0_21], %25 {strides = array<i32>} : memref<8x4xf32, #tpu.memory_space<vmem>>, vector<8x4xf32>,
    return
  }
  func.func @transform_0(%arg0: i32) -> (i32, i32) {
    %c0_i32 = arith.constant 0 : i32
    %c0_i32_0 = arith.constant 0 : i32
    return %arg0, %c0_i32 : i32, i32
  }
  func.func @transform_1(%arg0: i32) -> (i32, i32) {
    %c0_i32 = arith.constant 0 : i32
    %c0_i32_0 = arith.constant 0 : i32
    return %arg0, %c0_i32 : i32, i32
  }
  func.func @transform_2(%arg0: i32) -> (i32, i32) {
    %c0_i32 = arith.constant 0 : i32
    %c0_i32_0 = arith.constant 0 : i32
    %c0_i32_1 = arith.constant 0 : i32
    return %c0_i32, %c0_i32_0 : i32, i32
  }
  func.func @transform_3(%arg0: i32) -> (i32, i32) {
    %c0_i32 = arith.constant 0 : i32
    %c0_i32_0 = arith.constant 0 : i32
    %c0_i32_1 = arith.constant 0 : i32
    return %c0_i32, %c0_i32_0 : i32, i32
  }
  func.func @transform_4(%arg0: i32) -> (i32, i32) {
    %c0_i32 = arith.constant 0 : i32
    %c0_i32_0 = arith.constant 0 : i32
    %c0_i32_1 = arith.constant 0 : i32
    return %c0_i32, %c0_i32_0 : i32, i32
  }
  func.func @transform_5(%arg0: i32) -> (i32, i32) {
    %c0_i32 = arith.constant 0 : i32
    %c0_i32_0 = arith.constant 0 : i32
    %c0_i32_1 = arith.constant 0 : i32
    return %c0_i32, %c0_i32_0 : i32, i32
  }
  func.func @transform_6(%arg0: i32) -> (i32, i32) {
    %c0_i32 = arith.constant 0 : i32
    %c0_i32_0 = arith.constant 0 : i32
    %c0_i32_1 = arith.constant 0 : i32
    return %c0_i32, %c0_i32_0 : i32, i32
  }
  func.func @transform_7(%arg0: i32) -> (i32, i32) {
    %c0_i32 = arith.constant 0 : i32
    %c0_i32_0 = arith.constant 0 : i32
    %c0_i32_1 = arith.constant 0 : i32
    return %c0_i32, %c0_i32_0 : i32, i32
  }
  func.func @transform_8(%arg0: i32) -> (i32, i32) {
    %c0_i32 = arith.constant 0 : i32
    %c0_i32_0 = arith.constant 0 : i32
    return %arg0, %c0_i32 : i32, i32
  }
}

</mosaic_0001>

<bundles_post_ra>
// kernel: tpu_custom_call.1
= control target key start
LH: loop header
LB: loop body
LE: loop exit
PB: predicated region body
PF: predicated region fallthrough
CT: control target
= control target key end

     0   :  { %13 = vsyncpa [#allocation3], 0  ;;  %s670_s0 = inlined_call_operand.hbm [shape: f32[2,32], index: 0, kind: input, shape index: {}]   ;;  %s671_s1 = inlined_call_operand.hbm [shape: f32[2,4], index: 1, kind: input, shape index: {}]   ;;  %s672_s2 = inlined_call_operand.hbm [shape: bf16[32,32], index: 2, kind: input, shape index: {}]   ;;  %s673_s3 = inlined_call_operand.vmem [shape: bf16[4,32], index: 3, kind: input, shape index: {}]   ;;  %s674_s4 = inlined_call_operand.vmem [shape: f32[1,32], index: 4, kind: input, shape index: {}]   ;;  %s675_s5 = inlined_call_operand.hbm [shape: bf16[32,32], index: 5, kind: input, shape index: {}]   ;;  %s676_s6 = inlined_call_operand.vmem [shape: f32[1,32], index: 6, kind: input, shape index: {}]   ;;  %s677_s7 = inlined_call_operand.hbm [shape: bf16[32,128], index: 7, kind: input, shape index: {}]   ;;  %s678_s8 = inlined_call_operand.hbm [shape: f32[2,4], index: 8, kind: output, shape index: {}]  }
   0x1   :  { %14 = vsyncpa [#allocation6], 0 }
   0x2   :  { %15 = vsyncpa [#allocation9], 0 }
   0x3   :  { %16 = vsyncpa [#allocation4], 0 }
   0x4   :  { %21 = vsyncadd [#allocation3], 96  ;;  %s568_s27 = smov [#allocation2]  }
   0x5   :  { %s22_s28 = sshll.u32 %s568_s27, 4  ;;  %s23_s28 = int_to_ptr.vmem [resolvable:$true] %s22_s28 }
   0x6   :  { %s448_s29 = scalar_lea.vmem %s23_s28, 32  ;;  %s452_s30 = scalar_lea.vmem %s23_s28, 128 }
   0x7   :  { %p449_p0 = scmp.ne.s32.totalorder %s23_s28, %s448_s29  ;;  %p453_p1 = scmp.lt.s32.totalorder %s23_s28, %s23_s28 }
   0x8   :  { %p454_p2 = scmp.lt.s32.totalorder %s452_s30, %s448_s29 }
   0xa   :  { %p455_p3 = por %p454_p2, %p453_p1 }
   0xc   :  { %p456_p4 = pnand %p455_p3, %p449_p0 }
   0xe   :  { %459 = shalt.err (!%p456_p4)
}
   0xf   :  { %s569_s9 = smov 32   ;;  %s570_s10 = smov 2  }
  0x10   :  { %28 = dma.hbm_to_vmem [thread:$0]  %s670_s0, 32, %s23_s28, [#allocation3], %s569_s9, %s569_s9, %s570_s10  }
  0x11   :  { %33 = vsyncadd [#allocation6], 96  ;;  %s571_s13 = smov [#allocation5]  }
  0x12   :  { %s34_s14 = sshll.u32 %s571_s13, 4  ;;  %s35_s14 = int_to_ptr.vmem [resolvable:$true] %s34_s14 }
  0x13   :  { %s468_s15 = scalar_lea.vmem %s35_s14, 32  ;;  %s472_s16 = scalar_lea.vmem %s35_s14, 128 }
  0x14   :  { %p469_p5 = scmp.ne.s32.totalorder %s35_s14, %s468_s15  ;;  %p473_p6 = scmp.lt.s32.totalorder %s35_s14, %s35_s14 }
  0x15   :  { %p474_p7 = scmp.lt.s32.totalorder %s472_s16, %s468_s15 }
  0x17   :  { %p475_p8 = por %p474_p7, %p473_p6 }
  0x19   :  { %p476_p9 = pnand %p475_p8, %p469_p5 }
  0x1b   :  { %479 = shalt.err (!%p476_p9)
}
  0x1c   :  { %40 = dma.hbm_to_vmem [thread:$0]  %s671_s1, 32, %s35_s14, [#allocation6], %s569_s9, %s569_s9, %s570_s10  }
  0x1d   :  { %s572_s0 = smov [#allocation8]   ;;  %s573_s20 = smov [#allocation7]  }
  0x1e   :  { %s62_s19 = sshll.u32 %s572_s0, 4  ;;  %s46_s21 = sshll.u32 %s573_s20, 4  ;;  %s63_s19 = int_to_ptr.vmem [resolvable:$true] %s62_s19  ;;  %s47_s21 = int_to_ptr.vmem [resolvable:$true] %s46_s21 }
  0x1f   :  { %s488_s22 = scalar_lea.vmem %s63_s19, 256  ;;  %p493_p11 = scmp.lt.s32.totalorder %s63_s19, %s63_s19 }
  0x20   :  { %p489_p10 = scmp.ne.s32.totalorder %s63_s19, %s488_s22  ;;  %p494_p12 = scmp.lt.s32.totalorder %s488_s22, %s488_s22 }
  0x22   :  { %p495_p13 = por %p494_p12, %p493_p11 }
  0x24   :  { %p496_p0 = pnand %p495_p13, %p489_p10 }
  0x26   :  { %499 = shalt.err (!%p496_p0)
}
  0x27   :  { %s574_s23 = smov 64   ;;  %s575_s24 = smov 4  }
  0x28   :  { %68 = dma.hbm_to_vmem [thread:$0]  %s675_s5, 256, %s63_s19, [#allocation9], %s574_s23, %s574_s23, %s575_s24  }
  0x29   :  { %s508_s1 = scalar_lea.vmem %s47_s21, 256  ;;  %p513_p2 = scmp.lt.s32.totalorder %s47_s21, %s47_s21 }
  0x2a   :  { %p509_p1 = scmp.ne.s32.totalorder %s47_s21, %s508_s1  ;;  %p514_p3 = scmp.lt.s32.totalorder %s508_s1, %s508_s1 }
  0x2c   :  { %p515_p4 = por %p514_p3, %p513_p2 }
  0x2e   :  { %p516_p5 = pnand %p515_p4, %p509_p1 }
  0x30   :  { %519 = shalt.err (!%p516_p5)
}
  0x31   :  { %52 = dma.hbm_to_vmem [thread:$0]  %s672_s2, 256, %s47_s21, [#allocation6], %s574_s23, %s574_s23, %s575_s24  }
  0x32   :  { %s576_s29 = smov [#allocation10]  }
  0x33   :  { %s76_s30 = sshll.u32 %s576_s29, 4  ;;  %s77_s30 = int_to_ptr.vmem [resolvable:$true] %s76_s30 }
  0x34   :  { %s528_s11 = scalar_lea.vmem %s77_s30, 256  ;;  %p533_p7 = scmp.lt.s32.totalorder %s77_s30, %s77_s30 }
  0x35   :  { %p529_p6 = scmp.ne.s32.totalorder %s77_s30, %s528_s11  ;;  %p534_p8 = scmp.lt.s32.totalorder %s528_s11, %s528_s11 }
  0x37   :  { %p535_p9 = por %p534_p8, %p533_p7 }
  0x39   :  { %p536_p10 = pnand %p535_p9, %p529_p6 }
  0x3b   :  { %539 = shalt.err (!%p536_p10)
}
  0x3c   :  { %82 = dma.hbm_to_vmem [thread:$0]  %s677_s7, 256, %s77_s30, [#allocation9], %s574_s23, %s574_s23, %s575_s24  }
  0x3d   :  { %560 = dma.done.wait [#allocation3], 128  }
  0x3e   :  { %561 = vsyncadd [#allocation3], 4294967168 }
  0x3f   :  { %562 = dma.done.wait [#allocation6], 384  }
  0x40   :  { %563 = vsyncadd [#allocation6], 4294966912 }
  0x41   :  { %564 = dma.done.wait [#allocation9], 512  }
  0x42   :  { %565 = vsyncadd [#allocation9], 4294966784  ;;  %v577_v0 = vmov 0.0   ;;  %vm578_vm0 = vmmov 0   ;;  %vm112_vm1 = vcmask 1041408   ;;  %v434_v3 = vld [vmem:[#allocation7 + $0x8] sm:$0xff]  }
  0x43   :  { %392 = vmatprep.subr.bf16.mxu0 %v577_v0  ;;  %398 = vmatprep.subr.bf16.mxu1 %v577_v0  ;;  %v107_v1 = vld [vmem:[%s673_s3] sm:$0x3]  ;;  %v101_v4 = vld [vmem:[#allocation5] sm:$0xff]  ;;  %vm108_vm2 = vcmask 31744   ;;  %v435_v6 = vld [vmem:[#allocation7] sm:$0xff]   ;;  %vm168_vm3 = vcmask 261120  }
  0x44   :  { %394 = vmatprep.mubr.msk.bf16.mxu0 %vm578_vm0, %v577_v0  ;;  %402 = vmatprep.mubr.msk.bf16.mxu1 %vm578_vm0, %v577_v0  ;;  %v114_v2 = vsel %vm112_vm1, %v107_v1, 0  ;;  %v102_v5 = vpack.c.bf16 %v101_v4, %v101_v4  ;;  %v99_v7 = vld [vmem:[#allocation2] sm:$0xff]  ;;  %v436_v9 = vld [vmem:[#allocation8 + $0x8] sm:$0xff]   ;;  %v438_v11 = vld [vmem:[#allocation10 + $0x8] sm:$0xff]  }
  0x45   :  { %393 = vmatpush3.bf16.msra.mxu0 %v114_v2  ;;  %399 = vmatpush3.bf16.msra.mxu1 %v434_v3  ;;  %v100_v8 = vpack.c.bf16 %v99_v7, %v99_v7  ;;  %v437_v10 = vld [vmem:[#allocation8] sm:$0xff]   ;;  %v439_v25 = vld [vmem:[#allocation10] sm:$0xff]  }
  0x46   :  { %406 = vmatprep.subr.bf16.mxu0 %v577_v0  ;;  %400 = vmatprep.subr.bf16.mxu1 %v577_v0  ;;  %v373_v16 = vld [vmem:[%s674_s4] ss:$0 sm:$0xff] }
  0x47   :  { %v374_v26 = vld [vmem:[%s676_s6] ss:$0 sm:$0xff] }
  0x48   :  { %395 = vmatmul.mubr.msk.bf16.vlgmr.msra.gmra.mxu0 %vm108_vm2, %v102_v5 }
  0x49   :  { %410 = vmatprep.mubr.msk.bf16.mxu0 %vm578_vm0, %v577_v0  ;;  %401 = vmatpush3.bf16.msra.mxu1 %v435_v6 }
  0x4a   :  { %414 = vmatprep.subr.bf16.mxu1 %v577_v0  ;;  %407 = vmatpush3.bf16.msra.mxu0 %v436_v9 }
  0x4b   :  { %408 = vmatprep.subr.bf16.mxu0 %v577_v0 }
  0x4c   :  { %403 = vmatmul.mubr.msk.bf16.vlgmr.msra.gmra.mxu1 %vm168_vm3, %v100_v8 }
  0x4d   :  { %418 = vmatprep.mubr.msk.bf16.mxu1 %vm578_vm0, %v577_v0  ;;  %415 = vmatpush3.bf16.msra.mxu1 %v438_v11 }
  0x4e   :  { %409 = vmatpush3.bf16.msra.mxu0 %v437_v10  ;;  %416 = vmatprep.subr.bf16.mxu1 %v577_v0 }
  0x51   :  { %417 = vmatpush3.bf16.msra.mxu1 %v439_v25 }
 0x108   :  { %v150_v12 = vpop.f32.mrf.mxu0 }
 0x10a   :  { %v396_v13 = vpop.f32.mrf.mxu0 }
 0x10c   :  { %v153_v14 = vpop.f32.mrf.mxu0  ;;  %v206_v15 = vpop.f32.mrf.mxu1 }
 0x10d   :  { %v207_v17 = vadd.f32 %v206_v15, %v150_v12 }
 0x10e   :  { %v397_v18 = vpop.f32.mrf.mxu0  ;;  %v404_v19 = vpop.f32.mrf.mxu1 }
 0x10f   :  { %v219_v20 = vadd.f32 %v373_v16, %v207_v17 }
 0x110   :  { %v209_v21 = vpop.f32.mrf.mxu1 }
 0x111   :  { %v220_v22 = vmax.f32 %v219_v20, 0.0 }
 0x112   :  { %v405_v23 = vpop.f32.mrf.mxu1 }
 0x113   :  { %v221_v24 = vpack.c.bf16 %v220_v22, %v220_v22 }
 0x115   :  { %411 = vmatmul.mubr.msk.bf16.vlgmr.msra.gmra.mxu0 %vm168_vm3, %v221_v24 }
 0x1d5   :  { %v282_v27 = vpop.f32.mrf.mxu0 }
 0x1d6   :  { %v283_v28 = vadd.f32 %v374_v26, %v282_v27 }
 0x1d7   :  { %v412_v29 = vpop.f32.mrf.mxu0 }
 0x1d8   :  { %v288_v30 = vmax.f32 %v283_v28, 0.0 }
 0x1d9   :  { %v285_v31 = vpop.f32.mrf.mxu0 }
 0x1da   :  { %v289_v32 = vpack.c.bf16 %v288_v30, %v288_v30 }
 0x1db   :  { %v413_v33 = vpop.f32.mrf.mxu0 }
 0x1dc   :  { %419 = vmatmul.mubr.msk.bf16.vlgmr.msra.gmra.mxu1 %vm168_vm3, %v289_v32 }
 0x29c   :  { %v343_v34 = vpop.f32.mrf.mxu1 }
 0x29d   :  { %349 = vst.msk [vmem:[#allocation11] sm:$0xff] %vm108_vm2, %v343_v34 }
 0x29e   :  { %v420_v35 = vpop.f32.mrf.mxu1 }
 0x2a0   :  { %v346_v36 = vpop.f32.mrf.mxu1 }
 0x2a2   :  { %v421_v37 = vpop.f32.mrf.mxu1 }
 0x2a3   :  { %354 = vsyncadd [#allocation4], 96  ;;  %s579_s4 = smov [#allocation11]  }
 0x2a4   :  { %s355_s16 = sshll.u32 %s579_s4, 4  ;;  %s356_s16 = int_to_ptr.vmem [resolvable:$true] %s355_s16 }
 0x2a5   :  { %s540_s6 = scalar_lea.vmem %s356_s16, 32  ;;  %s544_s17 = scalar_lea.vmem %s356_s16, 128 }
 0x2a6   :  { %p541_p11 = scmp.ne.s32.totalorder %s356_s16, %s540_s6  ;;  %p545_p12 = scmp.lt.s32.totalorder %s356_s16, %s356_s16 }
 0x2a7   :  { %p546_p13 = scmp.lt.s32.totalorder %s544_s17, %s540_s6 }
 0x2a9   :  { %p547_p0 = por %p546_p13, %p545_p12 }
 0x2ab   :  { %p548_p1 = pnand %p547_p0, %p541_p11 }
 0x2ad   :  { %551 = shalt.err (!%p548_p1)
}
 0x2ae   :  { %361 = dma.vmem_to_hbm [thread:$0]  %s356_s16, 32, %s678_s8, [#allocation4], %s569_s9, %s569_s9, %s570_s10  }
 0x2af   :  { %566 = dma.done.wait [#allocation4], 128  }
 0x2b0   :  { %567 = vsyncadd [#allocation4], 4294967168 }
 0x2b1   :  { %365 = vsyncpa [#allocation3], 1 }
 0x2b2   :  { %366 = vsyncpa [#allocation6], 1 }
 0x2b3   :  { %367 = vsyncpa [#allocation9], 1 }
 0x2b4   :  { %368 = vsyncpa [#allocation4], 1 }

</bundles_post_ra>
